<compile_context>
chip_gen: v6e
topology: v6e:2x2x1
jax: 0.10.0
libtpu: 0.0.40
codegen_flags: <defaults>
</compile_context>

<pallas_src>
import jax
import jax.numpy as jnp
from jax.experimental import pallas as pl
from jax.experimental.pallas import tpu as pltpu

IGNORE_INDEX = -100
BOW_WT = 1.0          # `bow_wt` is an undefined-in-snippet global in the original script
_NEG_BIG = -1.0e30    # finite stand-in for -inf (keeps exp/max arithmetic NaN-free)

# Scoped-VMEM budget: above the ~20-24 MB working set of the tm=512/tv=2048/
# H=1024 LM-head tile, above v5e's 16 MiB default scoped limit, and well under
# v7x's 64 MiB physical VMEM (v5e/v6e have 128 MiB physical).
_VMEM_LIMIT_BYTES = 40 * 1024 * 1024


def _round_up(x, m):
    return (x + m - 1) // m * m


def _to_bf16(x):
    return x if x.dtype == jnp.bfloat16 else x.astype(jnp.bfloat16)


def _to_i32(x):
    return x if x.dtype == jnp.int32 else x.astype(jnp.int32)


# --------------------------------------------------------------------------
# Fused (rows, H) @ (H, V) + cross-entropy head, vocab-tiled online LSE,
# per-row-tile scalar (loss, valid) outputs.  grid = (row_tiles, vocab_tiles).
# --------------------------------------------------------------------------
def _make_ce_kernel(tv, v_total, rows_total, tm, mask_cols, per_row_mean, n_targets):
    """Refs:
      h_ref    (tm, H)    bf16  hidden rows (resident across the vocab axis)
      tgt_ref  (tm, K)    int32 targets per row (K=1 lm_head, K=#keys bow)
      w_ref    (H, tv)    bf16  streamed weight tile
      loss_ref (1,1,128)  f32   per-row-tile sum of losses
      stat_ref (1,1,128)  f32   per-row-tile sum of valid-target counts
      m_s/l_s/t_s (tm,1)  f32   online-LSE scratch: running max / sum / target logit
    """

    def kernel(h_ref, tgt_ref, w_ref, loss_ref, stat_ref, m_s, l_s, t_s):
        i = pl.program_id(0)
        j = pl.program_id(1)

        @pl.when(j == 0)
        def _():
            m_s[...] = jnp.full(m_s.shape, _NEG_BIG, jnp.float32)
            l_s[...] = jnp.zeros(l_s.shape, jnp.float32)
            t_s[...] = jnp.zeros(t_s.shape, jnp.float32)

        # bf16 x bf16 -> f32 on the MXU, one vocab tile of logits at a time.
        logits = jnp.dot(h_ref[...], w_ref[...],
                         preferred_element_type=jnp.float32)          # (tm, tv)
        col = jax.lax.broadcasted_iota(jnp.int32, logits.shape, 1)    # local col ids
        if mask_cols:
            # Ragged last vocab tile: OOB columns carry undefined weight data
            # and must not contribute.  limit >= tv on all earlier tiles.
            # TODO(synk): only the last tile needs this; applied every step to
            # avoid a large-array lax.cond (one extra VPU select per step).
            logits = jnp.where(col < (v_total - j * tv), logits, _NEG_BIG)

        # ---- online logsumexp across vocab tiles ----
        m_tile = jnp.max(logits, axis=-1, keepdims=True)               # (tm, 1)
        m_new = jnp.maximum(m_s[...], m_tile)
        l_s[...] = jnp.exp(m_s[...] - m_new) * l_s[...] + jnp.sum(
            jnp.exp(logits - m_new), axis=-1, keepdims=True)
        m_s[...] = m_new

        # ---- target-logit accumulation: shifted targets + select-accumulate ----
        tgt_local = tgt_ref[...] - j * tv                              # (tm, K); -100 never matches
        acc = t_s[...]
        for k in range(n_targets):                                     # K static & small
            acc = acc + jnp.sum(
                jnp.where(col == tgt_local[:, k:k + 1], logits, 0.0),
                axis=-1, keepdims=True)
        t_s[...] = acc

        # ---- finalize on the last vocab tile ----
        @pl.when(j == pl.num_programs(1) - 1)
        def _():
            lse = m_s[...] + jnp.log(l_s[...])                         # (tm, 1)
            tgt = tgt_ref[...]
            valid = jnp.sum((tgt != IGNORE_INDEX).astype(jnp.float32),
                            axis=-1, keepdims=True)                    # (tm, 1)
            # sum over valid targets of (lse - target_logit); ignored rows -> 0
            row_loss = valid * lse - t_s[...]
            if per_row_mean:
                row_loss = row_loss / jnp.maximum(valid, 1.0)
            # mask rows past the real row count (ragged last row tile)
            row_ids = i * tm + jax.lax.broadcasted_iota(jnp.int32, row_loss.shape, 0)
            row_ok = row_ids < rows_total
            row_loss = jnp.where(row_ok, row_loss, 0.0)
            valid = jnp.where(row_ok, valid, 0.0)
            loss_sum = jnp.sum(row_loss, axis=0, keepdims=True)        # (1, 1)
            stat_sum = jnp.sum(valid, axis=0, keepdims=True)           # (1, 1)
            loss_ref[...] = jnp.broadcast_to(loss_sum.reshape(1, 1, 1), loss_ref.shape)
            stat_ref[...] = jnp.broadcast_to(stat_sum.reshape(1, 1, 1), stat_ref.shape)

    return kernel


def _ce_head(hidden, targets, weight, *, tm, tv, per_row_mean):
    """Returns (sum of per-row losses, sum of valid-target counts)."""
    rows, h_dim = hidden.shape
    n_tgt = targets.shape[1]
    v = weight.shape[1]

    # tile sizes: clamp to the problem size; 16-multiples for bf16 sublane tiling
    tm = _round_up(min(tm, _round_up(rows, 16)), 16)
    tv = _round_up(min(tv, _round_up(v, 128)), 128)
    nr = pl.cdiv(rows, tm)
    nv = pl.cdiv(v, tv)
    mask_cols = (v % tv) != 0

    h = _to_bf16(hidden)
    w = _to_bf16(weight)
    t = _to_i32(targets)

    kernel = _make_ce_kernel(tv=tv, v_total=v, rows_total=rows, tm=tm,
                             mask_cols=mask_cols, per_row_mean=per_row_mean,
                             n_targets=n_tgt)

    loss_t, stat_t = pl.pallas_call(
        kernel,
        out_shape=(
            jax.ShapeDtypeStruct((nr, 1, 128), jnp.float32),
            jax.ShapeDtypeStruct((nr, 1, 128), jnp.float32),
        ),
        grid=(nr, nv),
        in_specs=[
            pl.BlockSpec((tm, h_dim), lambda i, j: (i, 0)),   # hidden rows (resident over j)
            pl.BlockSpec((tm, n_tgt), lambda i, j: (i, 0)),   # targets
            pl.BlockSpec((h_dim, tv), lambda i, j: (0, j)),   # streamed weight tile
        ],
        out_specs=(
            pl.BlockSpec((1, 1, 128), lambda i, j: (i, 0, 0)),
            pl.BlockSpec((1, 1, 128), lambda i, j: (i, 0, 0)),
        ),
        scratch_shapes=[pltpu.VMEM((tm, 1), jnp.float32)] * 3,
        compiler_params=pltpu.CompilerParams(
            dimension_semantics=("parallel", "arbitrary"),
            vmem_limit_bytes=_VMEM_LIMIT_BYTES),
    )(h, t, w)

    return jnp.sum(loss_t[:, 0, 0]), jnp.sum(stat_t[:, 0, 0])


# --------------------------------------------------------------------------
# Bow head: vocab-split partial LSE kernel (grid = (nsplit, vocab_tiles)),
# per-row (m, l, t) partials merged in JAX.  The leading "parallel" axis lets
# v7x run the two vocab halves on its two TensorCores; on 1-TC chips it is
# just a loop with no extra HBM traffic.
# --------------------------------------------------------------------------
def _make_bow_partial_kernel(tv, v_total, nvps, n_targets):
    def kernel(h_ref, tgt_ref, w_ref, m_out, l_out, t_out, m_s, l_s, t_s):
        s = pl.program_id(0)
        j = pl.program_id(1)

        @pl.when(j == 0)
        def _():
            m_s[...] = jnp.full(m_s.shape, _NEG_BIG, jnp.float32)
            l_s[...] = jnp.zeros(l_s.shape, jnp.float32)
            t_s[...] = jnp.zeros(t_s.shape, jnp.float32)

        logits = jnp.dot(h_ref[...], w_ref[...],
                         preferred_element_type=jnp.float32)           # (tm, tv)
        col = jax.lax.broadcasted_iota(jnp.int32, logits.shape, 1)
        off = (s * nvps + j) * tv                                       # global column offset
        # mask ragged / OOB columns of this split's tile (cheap: rows=B is tiny)
        logits = jnp.where(col < (v_total - off), logits, _NEG_BIG)

        m_tile = jnp.max(logits, axis=-1, keepdims=True)
        m_new = jnp.maximum(m_s[...], m_tile)
        l_s[...] = jnp.exp(m_s[...] - m_new) * l_s[...] + jnp.sum(
            jnp.exp(logits - m_new), axis=-1, keepdims=True)
        m_s[...] = m_new

        tgt_local = tgt_ref[...] - off
        acc = t_s[...]
        for k in range(n_targets):
            acc = acc + jnp.sum(
                jnp.where(col == tgt_local[:, k:k + 1], logits, 0.0),
                axis=-1, keepdims=True)
        t_s[...] = acc

        @pl.when(j == pl.num_programs(1) - 1)
        def _():
            m_out[...] = m_s[...].reshape(m_out.shape)
            l_out[...] = l_s[...].reshape(l_out.shape)
            t_out[...] = t_s[...].reshape(t_out.shape)

    return kernel


def _bow_lse_partials(h0, key_ids, w_bow, *, tv, nsplit):
    b, h_dim = h0.shape
    k = key_ids.shape[1]
    v = w_bow.shape[1]

    tm = _round_up(b, 16)
    tv = _round_up(min(tv, _round_up(v, 128)), 128)
    nv_blocks = pl.cdiv(v, tv)
    nsplit = max(1, min(nsplit, nv_blocks))
    if nv_blocks % nsplit != 0:
        nsplit = 1                     # keep every block index in range (no OOB DMA)
    nvps = nv_blocks // nsplit

    h = _to_bf16(h0)
    w = _to_bf16(w_bow)
    t = _to_i32(key_ids)

    kernel = _make_bow_partial_kernel(tv=tv, v_total=v, nvps=nvps, n_targets=k)

    m, l, tl = pl.pallas_call(
        kernel,
        out_shape=(jax.ShapeDtypeStruct((nsplit, tm, 1), jnp.float32),) * 3,
        grid=(nsplit, nvps),
        in_specs=[
            pl.BlockSpec((tm, h_dim), lambda s, j: (0, 0)),          # resident
            pl.BlockSpec((tm, k), lambda s, j: (0, 0)),              # resident
            pl.BlockSpec((h_dim, tv), lambda s, j: (0, s * nvps + j)),
        ],
        out_specs=(pl.BlockSpec((1, tm, 1), lambda s, j: (s, 0, 0)),) * 3,
        scratch_shapes=[pltpu.VMEM((tm, 1), jnp.float32)] * 3,
        compiler_params=pltpu.CompilerParams(
            dimension_semantics=("parallel", "arbitrary"),
            vmem_limit_bytes=_VMEM_LIMIT_BYTES),
    )(h, t, w)
    return m, l, tl


# --------------------------------------------------------------------------
# Loss heads
# --------------------------------------------------------------------------
def lm_cross_entropy(hidden_flat, labels_flat, w_lm, *, tm=512, tv=2048):
    """Mean CE over valid (label != -100) tokens, matching T5's lm_out.loss."""
    loss_sum, valid_sum = _ce_head(hidden_flat, labels_flat.reshape(-1, 1), w_lm,
                                   tm=tm, tv=tv, per_row_mean=False)
    # TODO(synk): torch returns NaN when every label is -100; we guard the denominator.
    return loss_sum / jnp.maximum(valid_sum, 1.0)


def bow_loss_fn(h0, key_ids, w_bow, *, tv=4096, nsplit=2):
    """Matches the PyTorch loop: per-example CE mean over valid keys, then / B."""
    b = h0.shape[0]
    m, l, t = _bow_lse_partials(h0, key_ids, w_bow, tv=tv, nsplit=nsplit)
    # two-pass LSE merge across vocab splits (tiny: B rows)
    m_g = jnp.max(m, axis=0)                                   # (tm, 1)
    l_g = jnp.sum(jnp.exp(m - m_g[None]) * l, axis=0)          # (tm, 1)
    lse = (m_g + jnp.log(l_g))[:b, 0]                          # (b,)
    t_g = jnp.sum(t, axis=0)[:b, 0]                            # (b,)
    valid = jnp.sum(key_ids != IGNORE_INDEX, axis=1).astype(jnp.float32)
    # TODO(synk): torch yields NaN for an example whose key_ids are all -100;
    # here such an example contributes 0 instead.
    per_ex = (valid * lse - t_g) / jnp.maximum(valid, 1.0)
    return jnp.sum(per_ex) / b


# --------------------------------------------------------------------------
# Model.forward equivalent (use_key branch)
# --------------------------------------------------------------------------
def model_forward(decoder_hidden, labels, key_ids, w_lm, w_bow, bow_wt=BOW_WT, *,
                  lm_tm=512, lm_tv=2048, bow_tv=4096, bow_vocab_splits=2):
    # TODO(synk): the pretrained T5ForConditionalGeneration backbone (encoder +
    # decoder self/cross attention stack, tokenizer resize) is not reimplemented;
    # `decoder_hidden` stands in for lm_out.decoder_hidden_states[-1].
    b, s, h_dim = decoder_hidden.shape

    hidden_flat = decoder_hidden.reshape(b * s, h_dim)
    labels_flat = labels.reshape(b * s)
    lm_loss = lm_cross_entropy(hidden_flat, labels_flat, w_lm, tm=lm_tm, tv=lm_tv)

    h0 = decoder_hidden[:, 0, :]          # == torch.permute(hidden, (1,0,2))[0]
    b_loss = bow_loss_fn(h0, key_ids, w_bow, tv=bow_tv, nsplit=bow_vocab_splits)

    return {"loss": bow_wt * b_loss + lm_loss}


if __name__ == "__main__":
    # Small deterministic shapes.  V deliberately not a multiple of 128 and
    # B*S not a multiple of 16 to exercise the ragged vocab/row masking paths.
    B, S, H, V, K = 2, 9, 128, 320, 4

    key = jax.random.PRNGKey(0)
    k_h, k_wlm, k_wbow, k_lbl, k_keys = jax.random.split(key, 5)

    decoder_hidden = jax.random.normal(k_h, (B, S, H), dtype=jnp.float32)
    # weights stored bf16 upstream, laid out (H, V) = torch weight.T
    w_lm = (jax.random.normal(k_wlm, (H, V), dtype=jnp.float32) * 0.02).astype(jnp.bfloat16)
    w_bow = (jax.random.normal(k_wbow, (H, V), dtype=jnp.float32) * 0.02).astype(jnp.bfloat16)

    labels = jax.random.randint(k_lbl, (B, S), 0, V, dtype=jnp.int32)
    labels = labels.at[:, -2:].set(IGNORE_INDEX)
    key_ids = jax.random.randint(k_keys, (B, K), 0, V, dtype=jnp.int32)
    key_ids = key_ids.at[0, -1].set(IGNORE_INDEX)

    # plain-JAX reference (bf16-rounded operands, f32 math) for a sanity check
    def ref_loss():
        hb = decoder_hidden.astype(jnp.bfloat16).astype(jnp.float32)
        wl = w_lm.astype(jnp.float32)
        wb = w_bow.astype(jnp.float32)
        logits = hb.reshape(B * S, H) @ wl
        lse = jax.scipy.special.logsumexp(logits, axis=-1)
        lbl = labels.reshape(-1)
        valid = lbl != IGNORE_INDEX
        tgt = jnp.take_along_axis(logits, jnp.where(valid, lbl, 0)[:, None], axis=1)[:, 0]
        lm = jnp.sum(jnp.where(valid, lse - tgt, 0.0)) / jnp.sum(valid)
        l0 = hb[:, 0, :] @ wb
        lse0 = jax.scipy.special.logsumexp(l0, axis=-1)
        kv = key_ids != IGNORE_INDEX
        t0 = jnp.take_along_axis(l0, jnp.where(kv, key_ids, 0), axis=1)
        per_ex = jnp.sum(jnp.where(kv, lse0[:, None] - t0, 0.0), axis=1) / jnp.sum(kv, axis=1)
        return BOW_WT * jnp.mean(per_ex) + lm

    loss_ref = ref_loss()

    # default (large) tiles -> single row/vocab tile, no bow vocab split
    out_a = model_forward(decoder_hidden, labels, key_ids, w_lm, w_bow)
    # small tiles -> multi row-tile + multi vocab-tile online LSE, ragged last
    # tiles on both axes, and a 2-way bow vocab split with a ragged half
    out_b = model_forward(decoder_hidden, labels, key_ids, w_lm, w_bow,
                          lm_tm=16, lm_tv=128, bow_tv=256, bow_vocab_splits=2)

    la = jax.block_until_ready(out_a["loss"])
    lb = jax.block_until_ready(out_b["loss"])

    assert jnp.isfinite(la) and jnp.isfinite(lb)
    assert jnp.abs(la - loss_ref) < 5e-2, (float(la), float(loss_ref))
    assert jnp.abs(lb - loss_ref) < 5e-2, (float(lb), float(loss_ref))
    assert jnp.abs(la - lb) < 5e-2
    print("KERNEL_OK")
</pallas_src>

<mosaic_0001>
module attributes {stable_mosaic.version = 11 : i64} {
  func.func @kernel(%arg0: i32, %arg1: i32, %arg2: memref<32x128xbf16, #tpu.memory_space<vmem>>, %arg3: memref<32x1xi32, #tpu.memory_space<vmem>>, %arg4: memref<128x384xbf16, #tpu.memory_space<vmem>>, %arg5: memref<1x1x128xf32, #tpu.memory_space<vmem>>, %arg6: memref<1x1x128xf32, #tpu.memory_space<vmem>>, %arg7: memref<32x1xf32, #tpu.memory_space<vmem>>, %arg8: memref<32x1xf32, #tpu.memory_space<vmem>>, %arg9: memref<32x1xf32, #tpu.memory_space<vmem>>) attributes {dimension_semantics = [#tpu.dimension_semantics<parallel>, #tpu.dimension_semantics<arbitrary>], iteration_bounds = array<i64: 1, 1>, scalar_prefetch = 0 : i64, scratch_operands = 3 : i64, tpu.core_type = #tpu.core_type<tc>, window_params = [{transform_indices = @transform_0, window_bounds = array<i64: 32, 128>}, {transform_indices = @transform_1, window_bounds = array<i64: 32, 1>}, {transform_indices = @transform_2, window_bounds = array<i64: 128, 384>}, {transform_indices = @transform_3, window_bounds = array<i64: 1, 1, 128>}, {transform_indices = @transform_4, window_bounds = array<i64: 1, 1, 128>}]} {
    %c0_i32 = arith.constant 0 : i32
    %0 = arith.cmpi eq, %arg1, %c0_i32 : i32
    %1 = arith.extui %0 : i1 to i32
    %c0_i32_0 = arith.constant 0 : i32
    %2 = arith.cmpi ne, %1, %c0_i32_0 : i32
    scf.if %2 {
      %cst_28 = arith.constant -1.000000e+30 : f32
      %46 = vector.broadcast %cst_28 : f32 to vector<32x1xf32>
      %c0_29 = arith.constant 0 : index
      %c0_30 = arith.constant 0 : index
      %47 = vector.load %arg7[%c0_29, %c0_30] : memref<32x1xf32, #tpu.memory_space<vmem>>, vector<32x1xf32>
      tpu.vector_store %arg7[%c0_29, %c0_30], %46 {strides = array<i32>} : memref<32x1xf32, #tpu.memory_space<vmem>>, vector<32x1xf32>,
      %cst_31 = arith.constant 0.000000e+00 : f32
      %48 = vector.broadcast %cst_31 : f32 to vector<32x1xf32>
      %c0_32 = arith.constant 0 : index
      %c0_33 = arith.constant 0 : index
      %49 = vector.load %arg8[%c0_32, %c0_33] : memref<32x1xf32, #tpu.memory_space<vmem>>, vector<32x1xf32>
      tpu.vector_store %arg8[%c0_32, %c0_33], %48 {strides = array<i32>} : memref<32x1xf32, #tpu.memory_space<vmem>>, vector<32x1xf32>,
      %cst_34 = arith.constant 0.000000e+00 : f32
      %50 = vector.broadcast %cst_34 : f32 to vector<32x1xf32>
      %c0_35 = arith.constant 0 : index
      %c0_36 = arith.constant 0 : index
      %51 = vector.load %arg9[%c0_35, %c0_36] : memref<32x1xf32, #tpu.memory_space<vmem>>, vector<32x1xf32>
      tpu.vector_store %arg9[%c0_35, %c0_36], %50 {strides = array<i32>} : memref<32x1xf32, #tpu.memory_space<vmem>>, vector<32x1xf32>,
    } else {
    }
    %c0 = arith.constant 0 : index
    %c0_1 = arith.constant 0 : index
    %3 = vector.load %arg2[%c0, %c0_1] : memref<32x128xbf16, #tpu.memory_space<vmem>>, vector<32x128xbf16>
    %c0_2 = arith.constant 0 : index
    %c0_3 = arith.constant 0 : index
    %4 = vector.load %arg4[%c0_2, %c0_3] : memref<128x384xbf16, #tpu.memory_space<vmem>>, vector<128x384xbf16>
    %cst = arith.constant dense<0.000000e+00> : vector<32x384xf32>
    %5 = tpu.matmul %3, %4, %cst {dimension_numbers = #tpu.dot_dimension_numbers<[1], [0], [0], [1], [0, 0, 1, 1], [], []>} : vector<32x128xbf16>, vector<128x384xbf16>, vector<32x384xf32> -> vector<32x384xf32>
    %6 = tpu.iota {dimensions = array<i32: 1>} : vector<32x384xi32>
    %c384_i32 = arith.constant 384 : i32
    %7 = arith.muli %arg1, %c384_i32 : i32
    %c320_i32 = arith.constant 320 : i32
    %8 = arith.subi %c320_i32, %7 : i32
    %9 = vector.broadcast %8 : i32 to vector<32x384xi32>
    %10 = arith.cmpi slt, %6, %9 : vector<32x384xi32>
    %cst_4 = arith.constant -1.000000e+30 : f32
    %11 = vector.broadcast %cst_4 : f32 to vector<32x384xf32>
    %12 = arith.select %10, %5, %11 : vector<32x384xi1>, vector<32x384xf32>
    %cst_5 = arith.constant dense<0xFF800000> : vector<32xf32>
    %13 = vector.multi_reduction <maximumf>, %12, %cst_5 [1] : vector<32x384xf32> to vector<32xf32>
    %14 = vector.shape_cast %13 : vector<32xf32> to vector<32x1xf32>
    %c0_6 = arith.constant 0 : index
    %c0_7 = arith.constant 0 : index
    %15 = vector.load %arg7[%c0_6, %c0_7] : memref<32x1xf32, #tpu.memory_space<vmem>>, vector<32x1xf32>
    %16 = arith.maximumf %15, %14 : vector<32x1xf32>
    %c0_8 = arith.constant 0 : index
    %c0_9 = arith.constant 0 : index
    %17 = vector.load %arg7[%c0_8, %c0_9] : memref<32x1xf32, #tpu.memory_space<vmem>>, vector<32x1xf32>
    %18 = arith.subf %17, %16 : vector<32x1xf32>
    %19 = math.exp %18 : vector<32x1xf32>
    %c0_10 = arith.constant 0 : index
    %c0_11 = arith.constant 0 : index
    %20 = vector.load %arg8[%c0_10, %c0_11] : memref<32x1xf32, #tpu.memory_space<vmem>>, vector<32x1xf32>
    %21 = arith.mulf %19, %20 : vector<32x1xf32>
    %22 = vector.broadcast %16 : vector<32x1xf32> to vector<32x384xf32>
    %23 = arith.subf %12, %22 : vector<32x384xf32>
    %24 = math.exp %23 : vector<32x384xf32>
    %cst_12 = arith.constant dense<0.000000e+00> : vector<32xf32>
    %25 = vector.multi_reduction <add>, %24, %cst_12 [1] : vector<32x384xf32> to vector<32xf32>
    %26 = vector.shape_cast %25 : vector<32xf32> to vector<32x1xf32>
    %27 = arith.addf %21, %26 : vector<32x1xf32>
    %c0_13 = arith.constant 0 : index
    %c0_14 = arith.constant 0 : index
    %28 = vector.load %arg8[%c0_13, %c0_14] : memref<32x1xf32, #tpu.memory_space<vmem>>, vector<32x1xf32>
    tpu.vector_store %arg8[%c0_13, %c0_14], %27 {strides = array<i32>} : memref<32x1xf32, #tpu.memory_space<vmem>>, vector<32x1xf32>,
    %c0_15 = arith.constant 0 : index
    %c0_16 = arith.constant 0 : index
    %29 = vector.load %arg7[%c0_15, %c0_16] : memref<32x1xf32, #tpu.memory_space<vmem>>, vector<32x1xf32>
    tpu.vector_store %arg7[%c0_15, %c0_16], %16 {strides = array<i32>} : memref<32x1xf32, #tpu.memory_space<vmem>>, vector<32x1xf32>,
    %c0_17 = arith.constant 0 : index
    %c0_18 = arith.constant 0 : index
    %30 = vector.load %arg3[%c0_17, %c0_18] : memref<32x1xi32, #tpu.memory_space<vmem>>, vector<32x1xi32>
    %c384_i32_19 = arith.constant 384 : i32
    %31 = arith.muli %arg1, %c384_i32_19 : i32
    %32 = vector.broadcast %31 : i32 to vector<32x1xi32>
    %33 = arith.subi %30, %32 : vector<32x1xi32>
    %c0_20 = arith.constant 0 : index
    %c0_21 = arith.constant 0 : index
    %34 = vector.load %arg9[%c0_20, %c0_21] : memref<32x1xf32, #tpu.memory_space<vmem>>, vector<32x1xf32>
    %35 = vector.broadcast %33 : vector<32x1xi32> to vector<32x384xi32>
    %36 = arith.cmpi eq, %6, %35 : vector<32x384xi32>
    %cst_22 = arith.constant 0.000000e+00 : f32
    %37 = vector.broadcast %cst_22 : f32 to vector<32x384xf32>
    %38 = arith.select %36, %12, %37 : vector<32x384xi1>, vector<32x384xf32>
    %cst_23 = arith.constant dense<0.000000e+00> : vector<32xf32>
    %39 = vector.multi_reduction <add>, %38, %cst_23 [1] : vector<32x384xf32> to vector<32xf32>
    %40 = vector.shape_cast %39 : vector<32xf32> to vector<32x1xf32>
    %41 = arith.addf %34, %40 : vector<32x1xf32>
    %c0_24 = arith.constant 0 : index
    %c0_25 = arith.constant 0 : index
    %42 = vector.load %arg9[%c0_24, %c0_25] : memref<32x1xf32, #tpu.memory_space<vmem>>, vector<32x1xf32>
    tpu.vector_store %arg9[%c0_24, %c0_25], %41 {strides = array<i32>} : memref<32x1xf32, #tpu.memory_space<vmem>>, vector<32x1xf32>,
    %c0_i32_26 = arith.constant 0 : i32
    %43 = arith.cmpi eq, %arg1, %c0_i32_26 : i32
    %44 = arith.extui %43 : i1 to i32
    %c0_i32_27 = arith.constant 0 : i32
    %45 = arith.cmpi ne, %44, %c0_i32_27 : i32
    scf.if %45 {
      %c0_28 = arith.constant 0 : index
      %c0_29 = arith.constant 0 : index
      %46 = vector.load %arg7[%c0_28, %c0_29] : memref<32x1xf32, #tpu.memory_space<vmem>>, vector<32x1xf32>
      %c0_30 = arith.constant 0 : index
      %c0_31 = arith.constant 0 : index
      %47 = vector.load %arg8[%c0_30, %c0_31] : memref<32x1xf32, #tpu.memory_space<vmem>>, vector<32x1xf32>
      %48 = math.log %47 : vector<32x1xf32>
      %49 = arith.addf %46, %48 : vector<32x1xf32>
      %c0_32 = arith.constant 0 : index
      %c0_33 = arith.constant 0 : index
      %50 = vector.load %arg3[%c0_32, %c0_33] : memref<32x1xi32, #tpu.memory_space<vmem>>, vector<32x1xi32>
      %c-100_i32 = arith.constant -100 : i32
      %51 = vector.broadcast %c-100_i32 : i32 to vector<32x1xi32>
      %52 = arith.cmpi ne, %50, %51 : vector<32x1xi32>
      %53 = arith.extui %52 : vector<32x1xi1> to vector<32x1xi32>
      %54 = arith.sitofp %53 : vector<32x1xi32> to vector<32x1xf32>
      %cst_34 = arith.constant dense<0.000000e+00> : vector<32xf32>
      %55 = vector.multi_reduction <add>, %54, %cst_34 [1] : vector<32x1xf32> to vector<32xf32>
      %56 = vector.shape_cast %55 : vector<32xf32> to vector<32x1xf32>
      %57 = arith.mulf %56, %49 : vector<32x1xf32>
      %c0_35 = arith.constant 0 : index
      %c0_36 = arith.constant 0 : index
      %58 = vector.load %arg9[%c0_35, %c0_36] : memref<32x1xf32, #tpu.memory_space<vmem>>, vector<32x1xf32>
      %59 = arith.subf %57, %58 : vector<32x1xf32>
      %c32_i32 = arith.constant 32 : i32
      %60 = arith.muli %arg0, %c32_i32 : i32
      %61 = tpu.iota {dimensions = array<i32: 0>} : vector<32x1xi32>
      %62 = vector.broadcast %60 : i32 to vector<32x1xi32>
      %63 = arith.addi %62, %61 : vector<32x1xi32>
      %c18_i32 = arith.constant 18 : i32
      %64 = vector.broadcast %c18_i32 : i32 to vector<32x1xi32>
      %65 = arith.cmpi slt, %63, %64 : vector<32x1xi32>
      %cst_37 = arith.constant 0.000000e+00 : f32
      %66 = vector.broadcast %cst_37 : f32 to vector<32x1xf32>
      %67 = arith.select %65, %59, %66 : vector<32x1xi1>, vector<32x1xf32>
      %cst_38 = arith.constant 0.000000e+00 : f32
      %68 = vector.broadcast %cst_38 : f32 to vector<32x1xf32>
      %69 = arith.select %65, %56, %68 : vector<32x1xi1>, vector<32x1xf32>
      %cst_39 = arith.constant dense<0.000000e+00> : vector<1xf32>
      %70 = vector.multi_reduction <add>, %67, %cst_39 [0] : vector<32x1xf32> to vector<1xf32>
      %71 = vector.shape_cast %70 : vector<1xf32> to vector<1x1xf32>
      %cst_40 = arith.constant dense<0.000000e+00> : vector<1xf32>
      %72 = vector.multi_reduction <add>, %69, %cst_40 [0] : vector<32x1xf32> to vector<1xf32>
      %73 = vector.shape_cast %72 : vector<1xf32> to vector<1x1xf32>
      %74 = vector.shape_cast %71 : vector<1x1xf32> to vector<1x1x1xf32>
      %75 = vector.shape_cast %74 : vector<1x1x1xf32> to vector<1x1x1xf32>
      %76 = vector.broadcast %75 : vector<1x1x1xf32> to vector<1x1x128xf32>
      %c0_41 = arith.constant 0 : index
      %c0_42 = arith.constant 0 : index
      %c0_43 = arith.constant 0 : index
      %77 = vector.load %arg5[%c0_41, %c0_42, %c0_43] : memref<1x1x128xf32, #tpu.memory_space<vmem>>, vector<1x1x128xf32>
      tpu.vector_store %arg5[%c0_41, %c0_42, %c0_43], %76 {strides = array<i32>} : memref<1x1x128xf32, #tpu.memory_space<vmem>>, vector<1x1x128xf32>,
      %78 = vector.shape_cast %73 : vector<1x1xf32> to vector<1x1x1xf32>
      %79 = vector.shape_cast %78 : vector<1x1x1xf32> to vector<1x1x1xf32>
      %80 = vector.broadcast %79 : vector<1x1x1xf32> to vector<1x1x128xf32>
      %c0_44 = arith.constant 0 : index
      %c0_45 = arith.constant 0 : index
      %c0_46 = arith.constant 0 : index
      %81 = vector.load %arg6[%c0_44, %c0_45, %c0_46] : memref<1x1x128xf32, #tpu.memory_space<vmem>>, vector<1x1x128xf32>
      tpu.vector_store %arg6[%c0_44, %c0_45, %c0_46], %80 {strides = array<i32>} : memref<1x1x128xf32, #tpu.memory_space<vmem>>, vector<1x1x128xf32>,
    } else {
    }
    return
  }
  func.func @transform_0(%arg0: i32, %arg1: i32) -> (i32, i32) {
    %c0_i32 = arith.constant 0 : i32
    %c0_i32_0 = arith.constant 0 : i32
    return %arg0, %c0_i32 : i32, i32
  }
  func.func @transform_1(%arg0: i32, %arg1: i32) -> (i32, i32) {
    %c0_i32 = arith.constant 0 : i32
    %c0_i32_0 = arith.constant 0 : i32
    return %arg0, %c0_i32 : i32, i32
  }
  func.func @transform_2(%arg0: i32, %arg1: i32) -> (i32, i32) {
    %c0_i32 = arith.constant 0 : i32
    %c0_i32_0 = arith.constant 0 : i32
    return %c0_i32, %arg1 : i32, i32
  }
  func.func @transform_3(%arg0: i32, %arg1: i32) -> (i32, i32, i32) {
    %c0_i32 = arith.constant 0 : i32
    %c0_i32_0 = arith.constant 0 : i32
    %c0_i32_1 = arith.constant 0 : i32
    return %arg0, %c0_i32, %c0_i32_0 : i32, i32, i32
  }
  func.func @transform_4(%arg0: i32, %arg1: i32) -> (i32, i32, i32) {
    %c0_i32 = arith.constant 0 : i32
    %c0_i32_0 = arith.constant 0 : i32
    %c0_i32_1 = arith.constant 0 : i32
    return %arg0, %c0_i32, %c0_i32_0 : i32, i32, i32
  }
}

</mosaic_0001>

<bundles_post_ra>
// kernel: tpu_custom_call.1
= control target key start
LH: loop header
LB: loop body
LE: loop exit
PB: predicated region body
PF: predicated region fallthrough
CT: control target
= control target key end

     0   :  { %10 = vsyncpa [#allocation6], 0  ;;  %v865_v2 = vmov 0   ;;  %s1187_s0 = inlined_call_operand.vmem [shape: bf16[18,128], index: 0, kind: input, shape index: {}]   ;;  %s1188_s1 = inlined_call_operand.vmem [shape: s32[18,1], index: 1, kind: input, shape index: {}]   ;;  %s1189_s2 = inlined_call_operand.vmem [shape: bf16[128,320], index: 2, kind: input, shape index: {}]   ;;  %s1190_s3 = inlined_call_operand.hbm [shape: f32[1,1,128], index: 3, kind: output, shape index: {0}]   ;;  %s1191_s4 = inlined_call_operand.hbm [shape: f32[1,1,128], index: 4, kind: output, shape index: {1}]  }
   0x1   :  { %v749_v0 = vld [vmem:[%s1189_s2 + $0xac] ss:$12 sps:$4 sm:$0xff]   ;;  %v751_v1 = vld [vmem:[%s1189_s2 + $0xb0] ss:$12 sps:$4 sm:$0xff]   ;;  %244 = vmatprep.mubr.bf16.mxu0 %v865_v2  ;;  %747 = vset.pattern.permute.xlu1 %v865_v2  ;;  %v752_v3 = vld [vmem:[%s1189_s2 + $0xa8] ss:$12 sps:$4 sm:$0xff]  }
   0x2   :  { %212 = vmatprep.subr.bf16.mxu0 %v749_v0  ;;  %748 = vset.pattern.permute.xlu0 %v865_v2  ;;  %v753_v4 = vld [vmem:[%s1189_s2 + $0x94] ss:$12 sps:$4 sm:$0xff]   ;;  %v755_v5 = vld [vmem:[%s1189_s2 + $0x98] ss:$12 sps:$4 sm:$0xff]   ;;  %v756_v6 = vld [vmem:[%s1189_s2 + $0x90] ss:$12 sps:$4 sm:$0xff]  }
   0x3   :  { %722 = vmatprep.subr.bf16.mxu1 %v751_v1  ;;  %213 = vmatpush1.bf16.msra.mxu0 %v752_v3  ;;  %v757_v7 = vld [vmem:[%s1189_s2 + $0x7c] ss:$12 sps:$4 sm:$0xff]   ;;  %v759_v8 = vld [vmem:[%s1189_s2 + $0x80] ss:$12 sps:$4 sm:$0xff]   ;;  %v760_v9 = vld [vmem:[%s1189_s2 + $0x78] ss:$12 sps:$4 sm:$0xff]  }
   0x4   :  { %723 = vmatpush3.bf16.msra.mxu1 %v751_v1  ;;  %214 = vmatprep.subr.bf16.mxu0 %v753_v4  ;;  %v761_v10 = vld [vmem:[%s1189_s2 + $0x64] ss:$12 sps:$4 sm:$0xff]   ;;  %v763_v11 = vld [vmem:[%s1189_s2 + $0x68] ss:$12 sps:$4 sm:$0xff]   ;;  %v764_v12 = vld [vmem:[%s1189_s2 + $0x60] ss:$12 sps:$4 sm:$0xff]  }
   0x5   :  { %724 = vmatprep.subr.bf16.mxu1 %v755_v5  ;;  %v765_v13 = vld [vmem:[%s1189_s2 + $0x4c] ss:$12 sps:$4 sm:$0xff]   ;;  %v767_v14 = vld [vmem:[%s1189_s2 + $0x50] ss:$12 sps:$4 sm:$0xff]   ;;  %v768_v15 = vld [vmem:[%s1189_s2 + $0x48] ss:$12 sps:$4 sm:$0xff]  }
   0x6   :  { %v769_v16 = vld [vmem:[%s1189_s2 + $0x34] ss:$12 sps:$4 sm:$0xff]   ;;  %v771_v17 = vld [vmem:[%s1189_s2 + $0x38] ss:$12 sps:$4 sm:$0xff]   ;;  %v772_v19 = vld [vmem:[%s1189_s2 + $0x30] ss:$12 sps:$4 sm:$0xff]  }
   0x7   :  { %215 = vmatpush1.bf16.msra.mxu0 %v756_v6  ;;  %v781_v18 = vld [vmem:[%s1187_s0] sm:$0xff]  }
   0x8   :  { %725 = vmatpush3.bf16.msra.mxu1 %v755_v5  ;;  %216 = vmatprep.subr.bf16.mxu0 %v757_v7 }
   0x9   :  { %726 = vmatprep.subr.bf16.mxu1 %v759_v8 }
   0xb   :  { %217 = vmatpush1.bf16.msra.mxu0 %v760_v9 }
   0xc   :  { %727 = vmatpush3.bf16.msra.mxu1 %v759_v8  ;;  %218 = vmatprep.subr.bf16.mxu0 %v761_v10 }
   0xd   :  { %728 = vmatprep.subr.bf16.mxu1 %v763_v11 }
   0xf   :  { %219 = vmatpush1.bf16.msra.mxu0 %v764_v12 }
  0x10   :  { %729 = vmatpush3.bf16.msra.mxu1 %v763_v11  ;;  %220 = vmatprep.subr.bf16.mxu0 %v765_v13 }
  0x11   :  { %730 = vmatprep.subr.bf16.mxu1 %v767_v14 }
  0x13   :  { %221 = vmatpush1.bf16.msra.mxu0 %v768_v15 }
  0x14   :  { %731 = vmatpush3.bf16.msra.mxu1 %v767_v14 }
  0x15   :  { %11 = vsyncpa [#allocation8], 0  ;;  %222 = vmatprep.subr.bf16.mxu0 %v769_v16  ;;  %732 = vmatprep.subr.bf16.mxu1 %v771_v17  ;;  %v773_v20 = vld [vmem:[%s1189_s2 + $0x1c] ss:$12 sps:$4 sm:$0xff]   ;;  %v775_v21 = vld [vmem:[%s1189_s2 + $0x20] ss:$12 sps:$4 sm:$0xff]   ;;  %v314_v27 = vlaneseq }
  0x16   :  { %738 = vmatprep.mubr.bf16.mxu1 %v781_v18  ;;  %v776_v22 = vld [vmem:[%s1189_s2 + $0x18] ss:$12 sps:$4 sm:$0xff]   ;;  %v779_v24 = vld [vmem:[%s1189_s2 + $0x8] ss:$12 sps:$4 sm:$0xff]   ;;  %v780_v25 = vld [vmem:[%s1189_s2] ss:$12 sps:$4 sm:$0xff]  }
  0x17   :  { %223 = vmatpush1.bf16.msra.mxu0 %v772_v19  ;;  %v777_v23 = vld [vmem:[%s1189_s2 + $0x4] ss:$12 sps:$4 sm:$0xff]   ;;  %v782_v26 = vld [vmem:[%s1187_s0 + $0x8] sm:$0xff]   ;;  %v978_v28 = vand.u32 127, %v314_v27  ;;  %vm23_vm1 = vcmask 7168   ;;  %v867_v51 = vmov 0.0  }
  0x18   :  { %733 = vmatpush3.bf16.msra.mxu1 %v771_v17  ;;  %224 = vmatprep.subr.bf16.mxu0 %v773_v20  ;;  %v866_v46 = vmov -1e+30   ;;  %28 = vst.msk [vmem:[#allocation3] sm:$0xff] %vm23_vm1, %v867_v51  ;;  %29 = vst.msk [vmem:[#allocation3 + $0x8] sm:$0xff] %vm23_vm1, %v867_v51  ;;  %v1074_v0 = vld [vmem:[%s1188_s1] sm:$0xff]  ;;  %v1080_v1 = vld [vmem:[%s1188_s1 + $0x8] sm:$0xff] }
  0x19   :  { %734 = vmatprep.subr.bf16.mxu1 %v775_v21  ;;  %v981_v29 = vadd.s32 256, %v978_v28  ;;  %24 = vst.msk [vmem:[#allocation2] sm:$0xff] %vm23_vm1, %v866_v46  ;;  %25 = vst.msk [vmem:[#allocation2 + $0x8] sm:$0xff] %vm23_vm1, %v866_v46  ;;  %vm565_vm14 = vcmp.ne.s32.totalorder %v1074_v0, 4294967196  ;;  %vm566_vm15 = vcmp.ne.s32.totalorder %v1080_v1, 4294967196 }
  0x1a   :  { %26 = vst.msk [vmem:[#allocation2 + $0x10] sm:$0xff] %vm23_vm1, %v866_v46  ;;  %27 = vst.msk [vmem:[#allocation2 + $0x18] sm:$0xff] %vm23_vm1, %v866_v46 }
  0x1b   :  { %225 = vmatpush1.bf16.msra.mxu0 %v776_v22  ;;  %vm323_vm0 = vcmp.lt.s32.totalorder %v981_v29, 320  ;;  %30 = vst.msk [vmem:[#allocation3 + $0x10] sm:$0xff] %vm23_vm1, %v867_v51  ;;  %31 = vst.msk [vmem:[#allocation3 + $0x18] sm:$0xff] %vm23_vm1, %v867_v51 }
  0x1c   :  { %735 = vmatpush3.bf16.msra.mxu1 %v775_v21  ;;  %226 = vmatprep.subr.bf16.mxu0 %v777_v23  ;;  %32 = vst.msk [vmem:[#allocation4] sm:$0xff] %vm23_vm1, %v867_v51  ;;  %33 = vst.msk [vmem:[#allocation4 + $0x8] sm:$0xff] %vm23_vm1, %v867_v51 }
  0x1d   :  { %736 = vmatprep.subr.bf16.mxu1 %v779_v24  ;;  %34 = vst.msk [vmem:[#allocation4 + $0x10] sm:$0xff] %vm23_vm1, %v867_v51  ;;  %35 = vst.msk [vmem:[#allocation4 + $0x18] sm:$0xff] %vm23_vm1, %v867_v51 }
  0x1f   :  { %227 = vmatpush1.bf16.msra.mxu0 %v780_v25 }
  0x20   :  { %737 = vmatpush3.bf16.msra.mxu1 %v779_v24  ;;  %v1041_v52 = vld [vmem:[#allocation2] sm:$0xff]  ;;  %v1046_v55 = vld [vmem:[#allocation2 + $0x8] sm:$0xff] }
  0x21   :  { %v1056_v59 = vld [vmem:[#allocation2 + $0x10] sm:$0xff] }
  0x22   :  { %245 = vmatmul.mubr.bf16.vlgmr.msra.gmra.mxu0 %v781_v18 }
  0x23   :  { %739 = vmatmul.mubr.bf16.vlgmr.msra.gmra.mxu1 %v782_v26  ;;  %254 = vmatprep.mubr.bf16.mxu0 %v865_v2  ;;  %v1086_v2 = vld [vmem:[%s1188_s1 + $0x10] sm:$0xff] }
  0x2a   :  { %255 = vmatmul.mubr.bf16.gmra.mxu0 %v782_v26 }
  0xe2   :  { %v983_v30 = vpop.f32.mrf.mxu0 }
  0xe3   :  { %v740_v31 = vpop.f32.mrf.mxu1 }
  0xe4   :  { %v986_v32 = vpop.f32.mrf.mxu0  ;;  %v1022_v49 = vsel %vm323_vm0, %v740_v31, -1e+30 }
  0xe5   :  { %v299_v33 = vpop.f32.mrf.mxu1  ;;  %v336_v35 = vmax.f32 %v983_v30, %v986_v32 }
  0xe6   :  { %v990_v34 = vsel %vm323_vm0, %v299_v33, -1e+30  ;;  %v994_v36 = vpop.f32.mrf.mxu0 }
  0xe7   :  { %v741_v37 = vpop.f32.mrf.mxu1  ;;  %v337_v39 = vmax.f32 %v336_v35, %v990_v34  ;;  %v1106_v35 = vadd.s32 128, %v978_v28 }
  0xe8   :  { %v998_v38 = vsel %vm323_vm0, %v741_v37, -1e+30  ;;  %v1001_v40 = vpop.f32.mrf.mxu0 }
  0xe9   :  { %v302_v41 = vpop.f32.mrf.mxu1  ;;  %338 = vmax.xlane.f32.xlu0 %v337_v39  ;;  %v340_v43 = vmax.f32 %v994_v36, %v1001_v40 }
  0xea   :  { %v1005_v42 = vsel %vm323_vm0, %v302_v41, -1e+30  ;;  %v1009_v44 = vpop.f32.mrf.mxu0  ;;  %vm567_vm0 = vcmp.ne.s32.totalorder %v1086_v2, 4294967196 }
  0xeb   :  { %v341_v45 = vmax.f32 %v340_v43, %v1005_v42 }
  0xec   :  { %v1016_v47 = vpop.f32.mrf.mxu0 }
  0xed   :  { %342 = vmax.xlane.f32.xlu0 %v341_v45  ;;  %v344_v48 = vmax.f32 %v1009_v44, %v1016_v47 }
  0xee   :  { %v1089_v3 = vpop.f32.mrf.mxu0 }
  0xef   :  { %v345_v50 = vmax.f32 %v344_v48, %v1022_v49 }
  0xf0   :  { %v1091_v4 = vpop.f32.mrf.mxu0 }
  0xf1   :  { %346 = vmax.xlane.f32.xlu1 %v345_v50  ;;  %v348_v5 = vmax.f32 %v1089_v3, %v1091_v4 }
  0xf3   :  { %v349_v6 = vmax.f32 %v348_v5, %v998_v38 }
 0x172   :  { %v339_v53 = vpop.xlane.xlu0 %338 }
 0x173   :  { %v1044_v54 = vmax.f32 %v1041_v52, %v339_v53 }
 0x175   :  { %v360_v56 = vsub.f32 %v1041_v52, %v1044_v54  ;;  %461 = vst.msk [vmem:[#allocation2] sm:$0xff] %vm23_vm1, %v1044_v54  ;;  %382 = vperm.xlu1 %747, %v1044_v54   ;;  %v475_v52 = vld [vmem:[#allocation4 + $0x8] sm:$0xff] }
 0x176   :  { %v343_v57 = vpop.xlane.xlu0 %342 }
 0x177   :  { %v1054_v58 = vmax.f32 %v1046_v55, %v343_v57 }
 0x179   :  { %v361_v60 = vsub.f32 %v1046_v55, %v1054_v58  ;;  %462 = vst.msk [vmem:[#allocation2 + $0x8] sm:$0xff] %vm23_vm1, %v1054_v58  ;;  %387 = vperm.xlu0 %748, %v1054_v58  }
 0x17a   :  { %v347_v61 = vpop.xlane.xlu1 %346 }
 0x17b   :  { %v1064_v62 = vmax.f32 %v1056_v59, %v347_v61 }
 0x17d   :  { %v362_v63 = vsub.f32 %v1056_v59, %v1064_v62  ;;  %463 = vst.msk [vmem:[#allocation2 + $0x10] sm:$0xff] %vm23_vm1, %v1064_v62  ;;  %392 = vperm.xlu1 %747, %v1064_v62  }
 0x181   :  { %479 = vperm.xlu1 %747, %v1074_v0  }
 0x185   :  { %482 = vperm.xlu1 %747, %v1080_v1   ;;  %v710_v1 = vsel %vm567_vm0, 1.0, %v867_v51 }
 0x189   :  { %485 = vperm.xlu1 %747, %v1086_v2  }
 0x1ad   :  { %350 = vmax.xlane.f32.xlu1 %v349_v6 }
 0x1f0   :  { %v383_v7 = vpop.permute.xlu1 %382 }
 0x1f1   :  { %v400_v8 = vsub.f32 %v983_v30, %v383_v7  ;;  %v401_v9 = vsub.f32 %v986_v32, %v383_v7  ;;  %v402_v10 = vsub.f32 %v990_v34, %v383_v7 }
 0x1f3   :  { %v412_v11 = vmul.f32 1.442695, %v400_v8  ;;  %v414_v12 = vmul.f32 1.442695, %v401_v9  ;;  %v416_v13 = vmul.f32 1.442695, %v402_v10 }
 0x1f4   :  { %v388_v14 = vpop.permute.xlu0 %387 }
 0x1f5   :  { %783 = vpow2.f32 %v412_v11  ;;  %v403_v15 = vsub.f32 %v994_v36, %v388_v14  ;;  %v404_v16 = vsub.f32 %v1001_v40, %v388_v14  ;;  %v405_v17 = vsub.f32 %v1005_v42, %v388_v14 }
 0x1f6   :  { %785 = vpow2.f32 %v414_v12 }
 0x1f7   :  { %v418_v18 = vmul.f32 1.442695, %v403_v15  ;;  %v420_v19 = vmul.f32 1.442695, %v404_v16  ;;  %787 = vpow2.f32 %v416_v13  ;;  %v422_v20 = vmul.f32 1.442695, %v405_v17 }
 0x1f8   :  { %v393_v21 = vpop.permute.xlu1 %392 }
 0x1f9   :  { %789 = vpow2.f32 %v418_v18  ;;  %v406_v22 = vsub.f32 %v1009_v44, %v393_v21  ;;  %v407_v23 = vsub.f32 %v1016_v47, %v393_v21  ;;  %v408_v24 = vsub.f32 %v1022_v49, %v393_v21  ;;  %v468_v21 = vld [vmem:[%s1188_s1 + $0x18] sm:$0xff]  ;;  %s868_s1 = smov [#allocation5]  }
 0x1fa   :  { %791 = vpow2.f32 %v420_v19  ;;  %s660_s21 = sshll.u32 %s868_s1, 4  ;;  %s661_s21 = int_to_ptr.vmem [resolvable:$true] %s660_s21 }
 0x1fb   :  { %v424_v25 = vmul.f32 1.442695, %v406_v22  ;;  %v426_v26 = vmul.f32 1.442695, %v407_v23  ;;  %793 = vpow2.f32 %v422_v20  ;;  %v428_v31 = vmul.f32 1.442695, %v408_v24  ;;  %p826_p1 = scmp.lt.s32.totalorder %s661_s21, %s661_s21 }
 0x1fc   :  { %v480_v33 = vpop.permute.xlu1 %479  ;;  %v366_v23 = vmul.f32 1.442695, %v361_v60  ;;  %v368_v24 = vmul.f32 1.442695, %v362_v63  ;;  %v374_v60 = vld [vmem:[#allocation3 + $0x10] sm:$0xff]  ;;  %s821_s22 = scalar_lea.vmem %s661_s21, 16 }
 0x1fd   :  { %795 = vpow2.f32 %v424_v25  ;;  %vm490_vm5 = vcmp.eq.s32.totalorder %v978_v28, %v480_v33  ;;  %vm491_vm6 = vcmp.eq.s32.totalorder %v1106_v35, %v480_v33  ;;  %vm492_vm9 = vcmp.eq.s32.totalorder %v981_v29, %v480_v33  ;;  %p822_p0 = scmp.ne.s32.totalorder %s661_s21, %s821_s22  ;;  %s825_s23 = scalar_lea.vmem %s661_s21, 32 }
 0x1fe   :  { %797 = vpow2.f32 %v426_v26  ;;  %v502_v11 = vsel %vm490_vm5, %v983_v30, 0.0  ;;  %v503_v12 = vsel %vm491_vm6, %v986_v32, 0.0  ;;  %v504_v30 = vsel %vm492_vm9, %v990_v34, 0.0  ;;  %v372_v26 = vld [vmem:[#allocation3] sm:$0xff]  ;;  %p827_p2 = scmp.lt.s32.totalorder %s825_s23, %s821_s22 }
 0x1ff   :  { %799 = vpow2.f32 %v428_v31 }
 0x200   :  { %v483_v37 = vpop.permute.xlu1 %482  ;;  %p828_p3 = por %p827_p2, %p826_p1 }
 0x201   :  { %vm493_vm2 = vcmp.eq.s32.totalorder %v978_v28, %v483_v37  ;;  %vm494_vm3 = vcmp.eq.s32.totalorder %v1106_v35, %v483_v37  ;;  %vm495_vm4 = vcmp.eq.s32.totalorder %v981_v29, %v483_v37 }
 0x202   :  { %v784_v39 = vpop.eup %783  ;;  %v505_v43 = vsel %vm493_vm2, %v994_v36, 0.0  ;;  %v506_v45 = vsel %vm494_vm3, %v1001_v40, 0.0  ;;  %v507_v36 = vsel %vm495_vm4, %v1005_v42, 0.0  ;;  %v514_v42 = vadd.f32 %v503_v12, %v502_v11  ;;  %p829_p4 = pnand %p828_p3, %p822_p0 }
 0x203   :  { %v786_v41 = vpop.eup %785  ;;  %v518_v57 = vadd.f32 %v506_v45, %v505_v43 }
 0x204   :  { %v436_v46 = vadd.f32 %v786_v41, %v784_v39  ;;  %v788_v48 = vpop.eup %787  ;;  %v486_v7 = vpop.permute.xlu1 %485  ;;  %v515_v32 = vadd.f32 %v514_v42, %v504_v30  ;;  %v373_v39 = vld [vmem:[#allocation3 + $0x8] sm:$0xff]  ;;  %v595_v42 = vshrl.u32 %v314_v27, 7 }
 0x205   :  { %v519_v9 = vadd.f32 %v518_v57, %v507_v36  ;;  %vm496_vm7 = vcmp.eq.s32.totalorder %v978_v28, %v486_v7  ;;  %vm497_vm8 = vcmp.eq.s32.totalorder %v1106_v35, %v486_v7  ;;  %vm498_vm10 = vcmp.eq.s32.totalorder %v981_v29, %v486_v7  ;;  %v476_v57 = vld [vmem:[#allocation4 + $0x10] sm:$0xff] }
 0x206   :  { %v790_v50 = vpop.eup %789  ;;  %v437_v53 = vadd.f32 %v788_v48, %v436_v46  ;;  %v508_v16 = vsel %vm496_vm7, %v1009_v44, 0.0  ;;  %v509_v17 = vsel %vm497_vm8, %v1016_v47, 0.0  ;;  %v510_v19 = vsel %vm498_vm10, %v1022_v49, 0.0  ;;  %v1129_v44 = vld [vmem:[#allocation2 + $0x18] sm:$0xff]  ;;  %v474_v46 = vld [vmem:[#allocation4] sm:$0xff] }
 0x207   :  { %v792_v61 = vpop.eup %791  ;;  %v522_v18 = vadd.f32 %v509_v17, %v508_v16  ;;  %v364_v49 = vmul.f32 1.442695, %v360_v56  ;;  %v542_v16 = vld [vmem:[#allocation2 + $0x8] sm:$0xff]  ;;  %v709_v17 = vsel %vm566_vm15, 1.0, %v867_v51 }
 0x208   :  { %438 = vadd.xlane.f32.xlu0 %v437_v53  ;;  %v440_v5 = vadd.f32 %v792_v61, %v790_v50  ;;  %v794_v6 = vpop.eup %793 }
 0x209   :  { %v523_v20 = vadd.f32 %v522_v18, %v510_v19  ;;  %801 = vpow2.f32 %v364_v49 }
 0x20a   :  { %v796_v8 = vpop.eup %795  ;;  %v441_v40 = vadd.f32 %v794_v6, %v440_v5  ;;  %803 = vpow2.f32 %v366_v23 }
 0x20b   :  { %v798_v10 = vpop.eup %797  ;;  %805 = vpow2.f32 %v368_v24 }
 0x20c   :  { %442 = vadd.xlane.f32.xlu1 %v441_v40  ;;  %520 = vadd.xlane.f32.xlu0 %v519_v9  ;;  %v444_v13 = vadd.f32 %v798_v10, %v796_v8  ;;  %v800_v14 = vpop.eup %799 }
 0x20e   :  { %v445_v15 = vadd.f32 %v800_v14, %v444_v13  ;;  %v541_v14 = vld [vmem:[#allocation2] sm:$0xff] }
 0x210   :  { %446 = vadd.xlane.f32.xlu1 %v445_v15 }
 0x214   :  { %516 = vadd.xlane.f32.xlu1 %v515_v32 }
 0x216   :  { %v802_v25 = vpop.eup %801 }
 0x217   :  { %v376_v31 = vmul.f32 %v802_v25, %v372_v26  ;;  %v804_v33 = vpop.eup %803 }
 0x218   :  { %524 = vadd.xlane.f32.xlu1 %v523_v20  ;;  %v377_v54 = vmul.f32 %v804_v33, %v373_v39  ;;  %v806_v56 = vpop.eup %805  ;;  %v597_v20 = vadd.s32 16, %v595_v42 }
 0x219   :  { %v378_v59 = vmul.f32 %v806_v56, %v374_v60 }
 0x21a   :  { %vm606_vm2 = vcmp.lt.s32.totalorder %v597_v20, 18 }
 0x21b   :  { %v614_v60 = vsel %vm606_vm2, %v710_v1, 0.0 }
 0x229   :  { %488 = vperm.xlu1 %747, %v468_v21   ;;  %v543_v21 = vld [vmem:[#allocation2 + $0x10] sm:$0xff] }
 0x236   :  { %v351_v47 = vpop.xlane.xlu1 %350 }
 0x237   :  { %v1132_v22 = vmax.f32 %v1129_v44, %v351_v47 }
 0x239   :  { %v363_v34 = vsub.f32 %v1129_v44, %v1132_v22  ;;  %464 = vst.msk [vmem:[#allocation2 + $0x18] sm:$0xff] %vm23_vm1, %v1132_v22  ;;  %397 = vperm.xlu0 %748, %v1132_v22  }
 0x291   :  { %v439_v37 = vpop.xlane.xlu0 %438 }
 0x292   :  { %v452_v41 = vadd.f32 %v439_v37, %v376_v31 }
 0x294   :  { %457 = vst.msk [vmem:[#allocation3] sm:$0xff] %vm23_vm1, %v452_v41 }
 0x295   :  { %v521_v55 = vpop.xlane.xlu0 %520  ;;  %v443_v58 = vpop.xlane.xlu1 %442 }
 0x296   :  { %v531_v43 = vadd.f32 %v521_v55, %v475_v52  ;;  %v453_v45 = vadd.f32 %v443_v58, %v377_v54 }
 0x298   :  { %535 = vst.msk [vmem:[#allocation4 + $0x8] sm:$0xff] %vm23_vm1, %v531_v43  ;;  %458 = vst.msk [vmem:[#allocation3 + $0x8] sm:$0xff] %vm23_vm1, %v453_v45 }
 0x299   :  { %v447_v62 = vpop.xlane.xlu1 %446 }
 0x29a   :  { %v454_v63 = vadd.f32 %v447_v62, %v378_v59  ;;  %v632_v62 = vsel %vm23_vm1, %v614_v60, 0.0 }
 0x29b   :  { %v545_v48 = vld [vmem:[#allocation3] sm:$0xff] }
 0x29c   :  { %459 = vst.msk [vmem:[#allocation3 + $0x10] sm:$0xff] %vm23_vm1, %v454_v63  ;;  %807 = vlog2.f32 %v545_v48 }
 0x29d   :  { %v517_v50 = vpop.xlane.xlu1 %516 }
 0x29e   :  { %v530_v53 = vadd.f32 %v517_v50, %v474_v46 }
 0x29f   :  { %v546_v61 = vld [vmem:[#allocation3 + $0x8] sm:$0xff] }
 0x2a0   :  { %534 = vst.msk [vmem:[#allocation4] sm:$0xff] %vm23_vm1, %v530_v53  ;;  %809 = vlog2.f32 %v546_v61  ;;  %v586_v47 = vld [vmem:[#allocation4 + $0x8] sm:$0xff] }
 0x2a1   :  { %v525_v5 = vpop.xlane.xlu1 %524 }
 0x2a2   :  { %v532_v6 = vadd.f32 %v525_v5, %v476_v57 }
 0x2a3   :  { %v547_v7 = vld [vmem:[#allocation3 + $0x10] sm:$0xff] }
 0x2a4   :  { %536 = vst.msk [vmem:[#allocation4 + $0x10] sm:$0xff] %vm23_vm1, %v532_v6  ;;  %811 = vlog2.f32 %v547_v7 }
 0x2a5   :  { %v489_v36 = vpop.permute.xlu1 %488 }
 0x2a6   :  { %vm499_vm11 = vcmp.eq.s32.totalorder %v978_v28, %v489_v36  ;;  %vm500_vm12 = vcmp.eq.s32.totalorder %v1106_v35, %v489_v36  ;;  %vm501_vm13 = vcmp.eq.s32.totalorder %v981_v29, %v489_v36  ;;  %v708_v29 = vsel %vm565_vm14, 1.0, %v867_v51 }
 0x2a7   :  { %v511_v8 = vsel %vm499_vm11, %v1089_v3, 0.0  ;;  %v512_v40 = vsel %vm500_vm12, %v1091_v4, 0.0  ;;  %v513_v11 = vsel %vm501_vm13, %v998_v38, 0.0  ;;  %v585_v24 = vld [vmem:[#allocation4] sm:$0xff]  ;;  %v629_v55 = vsel %vm23_vm1, %v708_v29, 0.0 }
 0x2a8   :  { %v526_v9 = vadd.f32 %v512_v40, %v511_v8 }
 0x2a9   :  { %v808_v10 = vpop.eup %807 }
 0x2aa   :  { %v527_v12 = vadd.f32 %v526_v9, %v513_v11  ;;  %v550_v13 = vmul.f32 0.6931472, %v808_v10 }
 0x2ab   :  { %v587_v41 = vld [vmem:[#allocation4 + $0x10] sm:$0xff] }
 0x2ac   :  { %528 = vadd.xlane.f32.xlu0 %v527_v12  ;;  %v557_v35 = vadd.f32 %v550_v13, %v541_v14  ;;  %v477_v13 = vld [vmem:[#allocation4 + $0x18] sm:$0xff] }
 0x2ad   :  { %v810_v28 = vpop.eup %809 }
 0x2ae   :  { %v552_v15 = vmul.f32 0.6931472, %v810_v28  ;;  %v581_v18 = vmul.f32 %v708_v29, %v557_v35  ;;  %v370_v35 = vmul.f32 1.442695, %v363_v34 }
 0x2b0   :  { %v558_v30 = vadd.f32 %v552_v15, %v542_v16  ;;  %v589_v2 = vsub.f32 %v581_v18, %v585_v24 }
 0x2b1   :  { %v812_v32 = vpop.eup %811 }
 0x2b2   :  { %v554_v0 = vmul.f32 0.6931472, %v812_v32  ;;  %v582_v19 = vmul.f32 %v709_v17, %v558_v30  ;;  %v616_v56 = vsel %vm23_vm1, %v589_v2, 0.0 }
 0x2b4   :  { %v398_v49 = vpop.permute.xlu0 %397  ;;  %v559_v23 = vadd.f32 %v554_v0, %v543_v21  ;;  %v590_v25 = vsub.f32 %v582_v19, %v586_v47 }
 0x2b5   :  { %v409_v27 = vsub.f32 %v1089_v3, %v398_v49  ;;  %v410_v26 = vsub.f32 %v1091_v4, %v398_v49  ;;  %v411_v31 = vsub.f32 %v998_v38, %v398_v49  ;;  %v630_v38 = vsel %vm23_vm1, %v709_v17, 0.0 }
 0x2b6   :  { %v583_v33 = vmul.f32 %v710_v1, %v559_v23  ;;  %v617_v52 = vsel %vm23_vm1, %v590_v25, 0.0  ;;  %v631_v45 = vadd.f32 %v630_v38, %v629_v55 }
 0x2b7   :  { %v430_v37 = vmul.f32 1.442695, %v409_v27  ;;  %v432_v39 = vmul.f32 1.442695, %v410_v26  ;;  %v434_v51 = vmul.f32 1.442695, %v411_v31  ;;  %v618_v4 = vadd.f32 %v617_v52, %v616_v56 }
 0x2b8   :  { %v591_v54 = vsub.f32 %v583_v33, %v587_v41  ;;  %v633_v46 = vadd.f32 %v632_v62, %v631_v45 }
 0x2b9   :  { %813 = vpow2.f32 %v430_v37 }
 0x2ba   :  { %815 = vpow2.f32 %v432_v39  ;;  %v610_v3 = vsel %vm606_vm2, %v591_v54, 0.0  ;;  %v636_v53 = vrot.slane %v633_v46, 4 }
 0x2bb   :  { %v619_v58 = vsel %vm23_vm1, %v610_v3, 0.0  ;;  %817 = vpow2.f32 %v434_v51 }
 0x2bc   :  { %v620_v43 = vadd.f32 %v619_v58, %v618_v4  ;;  %v637_v8 = vadd.f32 %v636_v53, %v633_v46  ;;  %819 = vpow2.f32 %v370_v35 }
 0x2be   :  { %v623_v59 = vrot.slane %v620_v43, 4  ;;  %v638_v9 = vrot.slane %v637_v8, 2 }
 0x2c0   :  { %v624_v63 = vadd.f32 %v623_v59, %v620_v43  ;;  %v639_v10 = vadd.f32 %v638_v9, %v637_v8 }
 0x2c2   :  { %v625_v48 = vrot.slane %v624_v63, 2  ;;  %v640_v11 = vrot.slane %v639_v10, 1 }
 0x2c4   :  { %v626_v50 = vadd.f32 %v625_v48, %v624_v63  ;;  %v641_v12 = vadd.f32 %v640_v11, %v639_v10 }
 0x2c6   :  { %v814_v57 = vpop.eup %813  ;;  %v627_v61 = vrot.slane %v626_v50, 1 }
 0x2c7   :  { %v816_v5 = vpop.eup %815 }
 0x2c8   :  { %v628_v6 = vadd.f32 %v627_v61, %v626_v50  ;;  %v448_v7 = vadd.f32 %v816_v5, %v814_v57  ;;  %v818_v36 = vpop.eup %817 }
 0x2ca   :  { %644 = vperm.xlu0 %748, %v628_v6   ;;  %v449_v40 = vadd.f32 %v818_v36, %v448_v7 }
 0x2cc   :  { %450 = vadd.xlane.f32.xlu1 %v449_v40 }
 0x2dd   :  { %650 = vperm.xlu1 %747, %v641_v12  }
 0x335   :  { %v529_v14 = vpop.xlane.xlu0 %528 }
 0x336   :  { %v533_v28 = vadd.f32 %v529_v14, %v477_v13 }
 0x338   :  { %537 = vst.msk [vmem:[#allocation4 + $0x18] sm:$0xff] %vm23_vm1, %v533_v28 }
 0x345   :  { %v645_v15 = vpop.permute.xlu0 %644 }
 0x346   :  { %647 = vst [vmem:[#allocation5] sm:$0x1] %v645_v15 }
 0x347   :  { %832 = shalt.err (!%p829_p4)
}
 0x348   :  { %663 = dma.vmem_to_hbm [thread:$0]  %s661_s21, 16, %s1190_s3, [#allocation6]   ;;  %v820_v44 = vpop.eup %819  ;;  %v375_v22 = vld [vmem:[#allocation3 + $0x18] sm:$0xff] }
 0x349   :  { %v379_v34 = vmul.f32 %v820_v44, %v375_v22  ;;  %s869_s26 = smov [#allocation7]  }
 0x34a   :  { %s670_s27 = sshll.u32 %s869_s26, 4  ;;  %s671_s27 = int_to_ptr.vmem [resolvable:$true] %s670_s27 }
 0x34b   :  { %s841_s28 = scalar_lea.vmem %s671_s27, 16  ;;  %s845_s29 = scalar_lea.vmem %s671_s27, 32 }
 0x34c   :  { %p842_p5 = scmp.ne.s32.totalorder %s671_s27, %s841_s28  ;;  %p846_p6 = scmp.lt.s32.totalorder %s671_s27, %s671_s27 }
 0x34d   :  { %p847_p7 = scmp.lt.s32.totalorder %s845_s29, %s841_s28 }
 0x34f   :  { %p848_p8 = por %p847_p7, %p846_p6 }
 0x351   :  { %p849_p9 = pnand %p848_p8, %p842_p5 }
 0x355   :  { %v451_v29 = vpop.xlane.xlu1 %450 }
 0x356   :  { %v455_v42 = vadd.f32 %v451_v29, %v379_v34 }
 0x358   :  { %460 = vst.msk [vmem:[#allocation3 + $0x18] sm:$0xff] %vm23_vm1, %v455_v42 }
 0x359   :  { %v651_v16 = vpop.permute.xlu1 %650 }
 0x35a   :  { %653 = vst [vmem:[#allocation7] sm:$0x1] %v651_v16 }
 0x35b   :  { %852 = shalt.err (!%p849_p9)
}
 0x35c   :  { %673 = dma.vmem_to_hbm [thread:$0]  %s671_s27, 16, %s1191_s4, [#allocation8]  }
 0x35d   :  { %861 = dma.done.wait [#allocation6], 16  }
 0x35e   :  { %862 = vsyncadd [#allocation6], 4294967280 }
 0x35f   :  { %863 = dma.done.wait [#allocation8], 16  }
 0x360   :  { %864 = vsyncadd [#allocation8], 4294967280 }
 0x361   :  { %680 = vsyncpa [#allocation6], 1 }
 0x362   :  { %681 = vsyncpa [#allocation8], 1 }

</bundles_post_ra>
